<compile_context>
chip_gen: v7x
topology: tpu7x:2x2x1
jax: 0.10.0
libtpu: 0.0.40
codegen_flags: <defaults>
</compile_context>

<pallas_src>
import jax
import jax.numpy as jnp
from jax.experimental import pallas as pl
from jax.experimental.pallas import tpu as pltpu


def _concat_dma_kernel(f1, f2, x1_hbm, x2_hbm, o_hbm, sem):
    # x1_hbm: (N, f1) in HBM, x2_hbm: (N, f2) in HBM, o_hbm: (N, f1+f2) in HBM.
    # Two direct HBM->HBM DMAs into the output's channel slices; overlap both.
    cp1 = pltpu.make_async_copy(x1_hbm, o_hbm.at[:, pl.ds(0, f1)], sem.at[0])
    cp2 = pltpu.make_async_copy(x2_hbm, o_hbm.at[:, pl.ds(f1, f2)], sem.at[1])
    cp1.start()
    cp2.start()
    cp1.wait()
    cp2.wait()


def concatenate(layer_1, layer_2):
    """cat((layer_1, layer_2), axis=1) for NCHW tensors via a Pallas DMA kernel."""
    assert layer_1.dtype == layer_2.dtype, "dtypes must match"
    n, c1, h, w = layer_1.shape
    n2, c2, h2, w2 = layer_2.shape
    assert (n, h, w) == (n2, h2, w2), "non-channel dims must match"

    f1 = c1 * h * w
    f2 = c2 * h * w
    dtype = layer_1.dtype

    # Free reshapes: per-batch channel slices of an NCHW tensor are contiguous,
    # so (N, C, H, W) -> (N, C*H*W) is a bitcast, not a copy.
    x1_flat = layer_1.reshape(n, f1)
    x2_flat = layer_2.reshape(n, f2)

    itemsize = jnp.dtype(dtype).itemsize
    total_bytes = n * (f1 + f2) * itemsize  # bytes read == bytes written

    kernel = lambda x1, x2, o, sem: _concat_dma_kernel(f1, f2, x1, x2, o, sem)

    out_flat = pl.pallas_call(
        kernel,
        out_shape=jax.ShapeDtypeStruct((n, f1 + f2), dtype),
        in_specs=[
            pl.BlockSpec(memory_space=pl.ANY),  # leave in HBM, no auto-DMA
            pl.BlockSpec(memory_space=pl.ANY),
        ],
        out_specs=pl.BlockSpec(memory_space=pl.ANY),
        scratch_shapes=[pltpu.SemaphoreType.DMA((2,))],
        cost_estimate=pl.CostEstimate(
            flops=0, transcendentals=0, bytes_accessed=2 * total_bytes
        ),
    )(x1_flat, x2_flat)

    # Free reshape back to NCHW.
    return out_flat.reshape(n, c1 + c2, h, w)


if __name__ == "__main__":
    key = jax.random.PRNGKey(0)
    k1, k2 = jax.random.split(key)

    # Small shapes: batch=2, channels=4 each, spatial=16x16 (NCHW).
    layer_1 = jax.random.normal(k1, (2, 4, 16, 16), dtype=jnp.float32)
    layer_2 = jax.random.normal(k2, (2, 4, 16, 16), dtype=jnp.float32)

    out = concatenate(layer_1, layer_2)
    out = jax.block_until_ready(out)

    ref = jnp.concatenate((layer_1, layer_2), axis=1)
    assert out.shape == (2, 8, 16, 16)
    assert jnp.array_equal(out, ref)

    print("KERNEL_OK")
</pallas_src>

<mosaic_0001>
module attributes {stable_mosaic.version = 11 : i64} {
  func.func @_lambda_(%arg0: memref<2x1024xf32, #tpu.memory_space<any>>, %arg1: memref<2x1024xf32, #tpu.memory_space<any>>, %arg2: memref<2x2048xf32, #tpu.memory_space<any>>, %arg3: memref<2x!tpu.dma_semaphore, #tpu.memory_space<semaphore_mem>>) attributes {dimension_semantics = [], scalar_prefetch = 0 : i64, scratch_operands = 1 : i64, tpu.core_type = #tpu.core_type<tc>} {
    %c0_i32 = arith.constant 0 : i32
    %c0_i32_0 = arith.constant 0 : i32
    %c0_i32_1 = arith.constant 0 : i32
    %0 = tpu.memref_slice %arg2[%c0_i32_0, %c0_i32_1] : memref<2x2048xf32, #tpu.memory_space<any>> -> memref<2x1024xf32, #tpu.memory_space<any>>
    %1 = tpu.memref_slice %arg3[%c0_i32] : memref<2x!tpu.dma_semaphore, #tpu.memory_space<semaphore_mem>> -> memref<1x!tpu.dma_semaphore, #tpu.memory_space<semaphore_mem>>
    %2 = tpu.memref_squeeze %1 : memref<1x!tpu.dma_semaphore, #tpu.memory_space<semaphore_mem>> -> memref<!tpu.dma_semaphore, #tpu.memory_space<semaphore_mem>>
    tpu.enqueue_dma source(%arg0 : memref<2x1024xf32, #tpu.memory_space<any>>) target(%0 : memref<2x1024xf32, #tpu.memory_space<any>>) target_semaphore(%2 : memref<!tpu.dma_semaphore, #tpu.memory_space<semaphore_mem>>)
    %c1_i32 = arith.constant 1 : i32
    %c0_i32_2 = arith.constant 0 : i32
    %c1024_i32 = arith.constant 1024 : i32
    %3 = tpu.memref_slice %arg2[%c0_i32_2, %c1024_i32] : memref<2x2048xf32, #tpu.memory_space<any>> -> memref<2x1024xf32, #tpu.memory_space<any>>
    %4 = tpu.memref_slice %arg3[%c1_i32] : memref<2x!tpu.dma_semaphore, #tpu.memory_space<semaphore_mem>> -> memref<1x!tpu.dma_semaphore, #tpu.memory_space<semaphore_mem>>
    %5 = tpu.memref_squeeze %4 : memref<1x!tpu.dma_semaphore, #tpu.memory_space<semaphore_mem>> -> memref<!tpu.dma_semaphore, #tpu.memory_space<semaphore_mem>>
    tpu.enqueue_dma source(%arg1 : memref<2x1024xf32, #tpu.memory_space<any>>) target(%3 : memref<2x1024xf32, #tpu.memory_space<any>>) target_semaphore(%5 : memref<!tpu.dma_semaphore, #tpu.memory_space<semaphore_mem>>)
    %c0_i32_3 = arith.constant 0 : i32
    %c0_i32_4 = arith.constant 0 : i32
    %c0_i32_5 = arith.constant 0 : i32
    %6 = tpu.memref_slice %arg2[%c0_i32_4, %c0_i32_5] : memref<2x2048xf32, #tpu.memory_space<any>> -> memref<2x1024xf32, #tpu.memory_space<any>>
    %7 = tpu.memref_slice %arg3[%c0_i32_3] : memref<2x!tpu.dma_semaphore, #tpu.memory_space<semaphore_mem>> -> memref<1x!tpu.dma_semaphore, #tpu.memory_space<semaphore_mem>>
    %8 = tpu.memref_squeeze %7 : memref<1x!tpu.dma_semaphore, #tpu.memory_space<semaphore_mem>> -> memref<!tpu.dma_semaphore, #tpu.memory_space<semaphore_mem>>
    tpu.wait_dma2 semaphore(%8 : memref<!tpu.dma_semaphore, #tpu.memory_space<semaphore_mem>>) src(%arg0 : memref<2x1024xf32, #tpu.memory_space<any>>) dst(%6 : memref<2x1024xf32, #tpu.memory_space<any>>)
    %c1_i32_6 = arith.constant 1 : i32
    %c0_i32_7 = arith.constant 0 : i32
    %c1024_i32_8 = arith.constant 1024 : i32
    %9 = tpu.memref_slice %arg2[%c0_i32_7, %c1024_i32_8] : memref<2x2048xf32, #tpu.memory_space<any>> -> memref<2x1024xf32, #tpu.memory_space<any>>
    %10 = tpu.memref_slice %arg3[%c1_i32_6] : memref<2x!tpu.dma_semaphore, #tpu.memory_space<semaphore_mem>> -> memref<1x!tpu.dma_semaphore, #tpu.memory_space<semaphore_mem>>
    %11 = tpu.memref_squeeze %10 : memref<1x!tpu.dma_semaphore, #tpu.memory_space<semaphore_mem>> -> memref<!tpu.dma_semaphore, #tpu.memory_space<semaphore_mem>>
    tpu.wait_dma2 semaphore(%11 : memref<!tpu.dma_semaphore, #tpu.memory_space<semaphore_mem>>) src(%arg1 : memref<2x1024xf32, #tpu.memory_space<any>>) dst(%9 : memref<2x1024xf32, #tpu.memory_space<any>>)
    return
  }
}

</mosaic_0001>

<bundles_post_ra>
// kernel: tpu_custom_call.1
= control target key start
LH: loop header
LB: loop body
LE: loop exit
PB: predicated region body
PF: predicated region fallthrough
CT: control target
= control target key end

     0   :  { %s65_s12 = smov [#allocation2]   ;;  %s66_s13 = smov [#allocation3]   ;;  %s97_s0 = inlined_call_operand.hbm [shape: f32[2,1024], index: 0, kind: input, shape index: {}]   ;;  %s98_s2 = inlined_call_operand.hbm [shape: f32[2,2048], index: 2, kind: output, shape index: {}]   ;;  %s99_s1 = inlined_call_operand.hbm [shape: f32[2,1024], index: 1, kind: input, shape index: {}]  }
   0x1   :  { %s20_s11 = scalar_lea.hbm %s98_s2, 256  ;;  %s67_s14 = smov 0  }
   0x2   :  { %19 = dma.general %s97_s0, 256, %s98_s2, %s65_s12, %s66_s13, [#allocation4], %s67_s14, 0  }
   0x3   :  { %s68_s19 = smov [#allocation2 + $0x1]   ;;  %s69_s20 = smov [#allocation5]  }
   0x4   :  { %34 = dma.general %s99_s1, 256, %s20_s11, %s68_s19, %s69_s20, [#allocation6], %s67_s14, 0  }
   0x5   :  { %61 = dma.done.wait [#allocation2], 256 }
   0x6   :  { %62 = vsyncadd [#allocation2], 4294967040 }
   0x7   :  { %63 = dma.done.wait [#allocation2 + $0x1], 256 }
   0x8   :  { %64 = vsyncadd [#allocation2 + $0x1], 4294967040 }
   0x9   :  { %41 = vsyncmov [#allocation2] }
   0xc   :  { %s42_s23 = vpop.sfrf %41 }
   0xd   :  { %p54_p0 = scmp.ne.s32.totalorder %s42_s23, 0 }
   0xf   :  { %46 = shalt.err (%p54_p0)  }
  0x10   :  { %48 = vsyncmov [#allocation2 + $0x1] }
  0x13   :  { %s49_s24 = vpop.sfrf %48 }
  0x14   :  { %p55_p1 = scmp.ne.s32.totalorder %s49_s24, 0 }
  0x16   :  { %53 = shalt.err (%p55_p1)  }

</bundles_post_ra>
